<compile_context>
chip_gen: v7x
topology: tpu7x:2x2x1
jax: 0.10.0
libtpu: 0.0.40
codegen_flags: <defaults>
</compile_context>

<pallas_src>
import functools

import jax
import jax.numpy as jnp
from jax.experimental import pallas as pl
from jax.experimental.pallas import tpu as pltpu


def _round_up(a: int, b: int) -> int:
    return (a + b - 1) // b * b


def _vmem_capacity_bytes() -> int:
    try:
        info = pltpu.get_tpu_info()
        cap = getattr(info, "vmem_capacity_bytes", None)
        if cap:
            return int(cap)
    except Exception:
        pass
    # Conservative fallback (v7x per-TensorCore VMEM size).
    return 64 * 1024 * 1024


def _choose_block_r(R: int, HW_pad: int, dtype_bytes: int, row_align: int) -> int:
    # Target a few-MiB native-dtype input block: amortizes the ~0.35 us
    # per-step overhead at the HBM roofline while leaving VMEM headroom for
    # the f32 temporaries even under v7x's 64 MiB VMEM.
    target_bytes = 4 << 20
    rows = target_bytes // max(HW_pad * dtype_bytes, 1)
    rows = max(row_align, (rows // row_align) * row_align)
    rows = min(rows, 2048)
    rows = min(rows, _round_up(R, row_align))
    # Prefer >= 4 grid steps when there are enough rows so the "parallel"
    # row axis has work for both v7x TensorCores and the pipeline overlaps.
    if R > 4 * row_align:
        rows = min(rows, _round_up(-(-R // 4), row_align))
    return max(rows, row_align)


def _adain_kernel(x_ref, wb_ref, o_ref, *, eps: float, hw: int, pad_lanes: int):
    # x_ref: (block_r, HW_pad) native dtype; wb_ref: (block_r, 2) f32
    #   wb[:, 0] = weight, wb[:, 1] = bias

    # Pass 1: mean (zero-padded lanes do not affect the sum; divide by true HW).
    s1 = jnp.sum(x_ref[...].astype(jnp.float32), axis=-1, keepdims=True)
    mean = s1 * jnp.float32(1.0 / hw)

    # Pass 2: centered (numerically stable) sum of squares, unbiased variance.
    d = x_ref[...].astype(jnp.float32) - mean
    ssq = jnp.sum(d * d, axis=-1, keepdims=True)
    if pad_lanes:
        # Each zero-padded lane contributed exactly (0 - mean)^2; remove it.
        ssq = ssq - jnp.float32(pad_lanes) * mean * mean
    inv_denom = jnp.float32(1.0 / max(hw - 1, 1))
    var = jnp.maximum(ssq, 0.0) * inv_denom
    inv_std = jax.lax.rsqrt(var + jnp.float32(eps))

    wb = wb_ref[...]
    scale = inv_std * wb[:, 0:1]            # (block_r, 1)
    shift = wb[:, 1:2] - mean * scale       # (block_r, 1)

    # Fused affine; re-read the VMEM-resident input instead of keeping the
    # f32 upcast live across the reductions (cuts VMEM/vreg pressure).
    o_ref[...] = (x_ref[...].astype(jnp.float32) * scale + shift).astype(o_ref.dtype)


def adaptive_instance_norm_2d(x, bias, weight, *, eps: float = 1e-5):
    """x: (N, C, H, W); bias/weight per-(n, c) affine params ((N, C, 1, 1))."""
    N, C, H, W = x.shape
    R, HW = N * C, H * W
    dtype_bytes = jnp.dtype(x.dtype).itemsize
    row_align = 8 if dtype_bytes >= 4 else (16 if dtype_bytes == 2 else 32)

    # Native-dtype slab view; reshape of a contiguous NCHW tensor is free.
    x2 = x.reshape(R, HW)

    # Lane padding only when HW is small and misaligned: keeps the output
    # lane-dense (unmasked vst) at the cost of one extra pad/slice pass.
    pad_lanes = 0
    if HW % 128 != 0 and HW <= 4096:
        pad_lanes = (-HW) % 128
        x2 = jnp.pad(x2, ((0, 0), (0, pad_lanes)))
    HW_pad = HW + pad_lanes

    def _per_row(p):
        p = jnp.asarray(p, jnp.float32)
        if p.size == R:
            return p.reshape(R)
        return jnp.broadcast_to(p.reshape(1, -1), (N, C)).reshape(R)

    wb = jnp.stack([_per_row(weight), _per_row(bias)], axis=-1)  # (R, 2) f32

    block_r = _choose_block_r(R, HW_pad, dtype_bytes, row_align)
    grid = (pl.cdiv(R, block_r),)  # ragged edge block handled by Pallas

    # VMEM accounting: double-buffered in/out blocks + f32 in-kernel temps.
    block_io = block_r * HW_pad * dtype_bytes
    f32_tmp = 2 * block_r * HW_pad * 4
    need = 4 * block_io + 4 * block_r * 2 * 4 + f32_tmp
    vmem_cap = _vmem_capacity_bytes()
    vmem_limit = min(vmem_cap - (8 << 20), max(32 << 20, need + (8 << 20)))

    kernel = functools.partial(_adain_kernel, eps=eps, hw=HW, pad_lanes=pad_lanes)

    cost = pl.CostEstimate(
        flops=6 * R * HW_pad,
        transcendentals=R,
        bytes_accessed=2 * R * HW_pad * dtype_bytes + R * 8,
    )

    out2 = pl.pallas_call(
        kernel,
        out_shape=jax.ShapeDtypeStruct((R, HW_pad), x.dtype),
        grid_spec=pltpu.PrefetchScalarGridSpec(
            num_scalar_prefetch=0,
            grid=grid,
            in_specs=[
                pl.BlockSpec((block_r, HW_pad), lambda i: (i, 0)),
                pl.BlockSpec((block_r, 2), lambda i: (i, 0)),
            ],
            out_specs=pl.BlockSpec((block_r, HW_pad), lambda i: (i, 0)),
        ),
        compiler_params=pltpu.CompilerParams(
            dimension_semantics=("parallel",),
            vmem_limit_bytes=vmem_limit,
        ),
        cost_estimate=cost,
    )(x2, wb)

    if pad_lanes:
        out2 = out2[:, :HW]
    return out2.reshape(N, C, H, W)


def _reference(x, bias, weight, eps=1e-5):
    N, C, H, W = x.shape
    xf = x.astype(jnp.float32).reshape(N, C, -1)
    mean = xf.mean(axis=2).reshape(N, C, 1, 1)
    var = xf.var(axis=2, ddof=1).reshape(N, C, 1, 1)  # unbiased
    std = jnp.sqrt(var + eps)
    normed = (x.astype(jnp.float32) - mean) / std
    return normed * weight.reshape(N, C, 1, 1) + bias.reshape(N, C, 1, 1)


if __name__ == "__main__":
    key = jax.random.PRNGKey(0)
    kx, kw, kb = jax.random.split(key, 3)

    N, C, H, W = 2, 4, 16, 16  # dim = C = 4
    x = jax.random.normal(kx, (N, C, H, W), dtype=jnp.float32)
    # weight / bias are assigned externally in the original module (AdaIN);
    # generate them deterministically here with per-(n, c) values.
    weight = jax.random.normal(kw, (N, C, 1, 1), dtype=jnp.float32)
    bias = jax.random.normal(kb, (N, C, 1, 1), dtype=jnp.float32)

    out = adaptive_instance_norm_2d(x, bias, weight, eps=1e-5)
    out = jax.block_until_ready(out)

    ref = _reference(x, bias, weight, eps=1e-5)
    assert out.shape == (N, C, H, W)
    assert jnp.allclose(out, ref, atol=1e-4, rtol=1e-4), "mismatch vs reference"

    print("KERNEL_OK")
</pallas_src>

<mosaic_0001>
module attributes {stable_mosaic.version = 11 : i64} {
  func.func @_adain_kernel(%arg0: i32, %arg1: memref<8x256xf32, #tpu.memory_space<vmem>>, %arg2: memref<8x2xf32, #tpu.memory_space<vmem>>, %arg3: memref<8x256xf32, #tpu.memory_space<vmem>>) attributes {dimension_semantics = [#tpu.dimension_semantics<parallel>], iteration_bounds = array<i64: 1>, scalar_prefetch = 0 : i64, scratch_operands = 0 : i64, tpu.core_type = #tpu.core_type<tc>, window_params = [{transform_indices = @transform_0, window_bounds = array<i64: 8, 256>}, {transform_indices = @transform_1, window_bounds = array<i64: 8, 2>}, {transform_indices = @transform_2, window_bounds = array<i64: 8, 256>}]} {
    %c0 = arith.constant 0 : index
    %c0_0 = arith.constant 0 : index
    %0 = vector.load %arg1[%c0, %c0_0] : memref<8x256xf32, #tpu.memory_space<vmem>>, vector<8x256xf32>
    %cst = arith.constant dense<0.000000e+00> : vector<8xf32>
    %1 = vector.multi_reduction <add>, %0, %cst [1] : vector<8x256xf32> to vector<8xf32>
    %2 = vector.shape_cast %1 : vector<8xf32> to vector<8x1xf32>
    %cst_1 = arith.constant 3.906250e-03 : f32
    %3 = vector.broadcast %cst_1 : f32 to vector<8x1xf32>
    %4 = arith.mulf %2, %3 : vector<8x1xf32>
    %c0_2 = arith.constant 0 : index
    %c0_3 = arith.constant 0 : index
    %5 = vector.load %arg1[%c0_2, %c0_3] : memref<8x256xf32, #tpu.memory_space<vmem>>, vector<8x256xf32>
    %6 = vector.broadcast %4 : vector<8x1xf32> to vector<8x256xf32>
    %7 = arith.subf %5, %6 : vector<8x256xf32>
    %8 = arith.mulf %7, %7 : vector<8x256xf32>
    %cst_4 = arith.constant dense<0.000000e+00> : vector<8xf32>
    %9 = vector.multi_reduction <add>, %8, %cst_4 [1] : vector<8x256xf32> to vector<8xf32>
    %10 = vector.shape_cast %9 : vector<8xf32> to vector<8x1xf32>
    %cst_5 = arith.constant 0.000000e+00 : f32
    %11 = vector.broadcast %cst_5 : f32 to vector<8x1xf32>
    %12 = arith.maximumf %10, %11 : vector<8x1xf32>
    %cst_6 = arith.constant 0.00392156886 : f32
    %13 = vector.broadcast %cst_6 : f32 to vector<8x1xf32>
    %14 = arith.mulf %12, %13 : vector<8x1xf32>
    %cst_7 = arith.constant 9.99999974E-6 : f32
    %15 = vector.broadcast %cst_7 : f32 to vector<8x1xf32>
    %16 = arith.addf %14, %15 : vector<8x1xf32>
    %17 = math.rsqrt %16 : vector<8x1xf32>
    %c0_8 = arith.constant 0 : index
    %c0_9 = arith.constant 0 : index
    %18 = vector.load %arg2[%c0_8, %c0_9] : memref<8x2xf32, #tpu.memory_space<vmem>>, vector<8x2xf32>
    %19 = vector.extract_strided_slice %18 {offsets = [0, 0], sizes = [8, 1], strides = [1, 1]} : vector<8x2xf32> to vector<8x1xf32>
    %20 = arith.mulf %17, %19 : vector<8x1xf32>
    %21 = vector.extract_strided_slice %18 {offsets = [0, 1], sizes = [8, 1], strides = [1, 1]} : vector<8x2xf32> to vector<8x1xf32>
    %22 = arith.mulf %4, %20 : vector<8x1xf32>
    %23 = arith.subf %21, %22 : vector<8x1xf32>
    %c0_10 = arith.constant 0 : index
    %c0_11 = arith.constant 0 : index
    %24 = vector.load %arg1[%c0_10, %c0_11] : memref<8x256xf32, #tpu.memory_space<vmem>>, vector<8x256xf32>
    %25 = vector.broadcast %20 : vector<8x1xf32> to vector<8x256xf32>
    %26 = arith.mulf %24, %25 : vector<8x256xf32>
    %27 = vector.broadcast %23 : vector<8x1xf32> to vector<8x256xf32>
    %28 = arith.addf %26, %27 : vector<8x256xf32>
    %c0_12 = arith.constant 0 : index
    %c0_13 = arith.constant 0 : index
    %29 = vector.load %arg3[%c0_12, %c0_13] : memref<8x256xf32, #tpu.memory_space<vmem>>, vector<8x256xf32>
    tpu.vector_store %arg3[%c0_12, %c0_13], %28 {strides = array<i32>} : memref<8x256xf32, #tpu.memory_space<vmem>>, vector<8x256xf32>,
    return
  }
  func.func @transform_0(%arg0: i32) -> (i32, i32) {
    %c0_i32 = arith.constant 0 : i32
    %c0_i32_0 = arith.constant 0 : i32
    return %arg0, %c0_i32 : i32, i32
  }
  func.func @transform_1(%arg0: i32) -> (i32, i32) {
    %c0_i32 = arith.constant 0 : i32
    %c0_i32_0 = arith.constant 0 : i32
    return %arg0, %c0_i32 : i32, i32
  }
  func.func @transform_2(%arg0: i32) -> (i32, i32) {
    %c0_i32 = arith.constant 0 : i32
    %c0_i32_0 = arith.constant 0 : i32
    return %arg0, %c0_i32 : i32, i32
  }
}

</mosaic_0001>

<bundles_post_ra>
// kernel: tpu_custom_call.1
= control target key start
LH: loop header
LB: loop body
LE: loop exit
PB: predicated region body
PF: predicated region fallthrough
CT: control target
= control target key end

     0   :  { %7 = vsyncpa [#allocation3], 0  ;;  %s184_s0 = inlined_call_operand.hbm [shape: f32[8,256], index: 0, kind: input, shape index: {}]   ;;  %s185_s1 = inlined_call_operand.vmem [shape: f32[8,2], index: 1, kind: input, shape index: {}]   ;;  %s186_s2 = inlined_call_operand.hbm [shape: f32[8,256], index: 2, kind: output, shape index: {}]  }
   0x1   :  { %8 = vsyncpa [#allocation4], 0  ;;  %s137_s9 = smov [#allocation2]   ;;  %s89_s13 = scalar_lea.hbm %s184_s0, 256 }
   0x2   :  { %s15_s10 = sshll.u32 %s137_s9, 4  ;;  %p90_p0 = scmp.ne.s32.totalorder %s184_s0, %s89_s13  ;;  %s16_s10 = int_to_ptr.vmem [resolvable:$true] %s15_s10 }
   0x3   :  { %p93_p1 = scmp.lt.u32.totalorder %s89_s13, %s184_s0 }
   0x5   :  { %p95_p2 = pnand %p93_p1, %p90_p0 }
   0x7   :  { %98 = shalt.err (!%p95_p2)
}
   0x8   :  { %s99_s18 = scalar_lea.vmem %s16_s10, 256  ;;  %p104_p4 = scmp.lt.s32.totalorder %s16_s10, %s16_s10 }
   0x9   :  { %p100_p3 = scmp.ne.s32.totalorder %s16_s10, %s99_s18  ;;  %p105_p5 = scmp.lt.s32.totalorder %s99_s18, %s99_s18 }
   0xb   :  { %p106_p6 = por %p105_p5, %p104_p4 }
   0xd   :  { %p107_p7 = pnand %p106_p6, %p100_p3 }
   0xf   :  { %110 = shalt.err (!%p107_p7)
}
  0x10   :  { %18 = dma.hbm_to_vmem [thread:$0]  %s184_s0, 256, %s16_s10, [#allocation3]  }
  0x11   :  { %133 = dma.done.wait [#allocation3], 256  }
  0x12   :  { %134 = vsyncadd [#allocation3], 4294967040  ;;  %v24_v0 = vld [vmem:[#allocation2] sm:$0xff]  ;;  %v25_v1 = vld [vmem:[#allocation2 + $0x8] sm:$0xff]  ;;  %v138_v10 = vmov 0   ;;  %v139_v15 = vmov 1  }
  0x13   :  { %v26_v2 = vadd.f32 %v25_v1, %v24_v0  ;;  %85 = vset.pattern.permute.xlu1 %v138_v10  ;;  %86 = vset.pattern.permute.xlu0 %v139_v15  ;;  %v41_v16 = vld [vmem:[%s185_s1] sm:$0xff]  ;;  %s140_s22 = smov 1   ;;  %s141_s23 = smov [#allocation5]  }
  0x14   :  { %s71_s24 = sshll.u32 %s141_s23, 4  ;;  %s72_s24 = int_to_ptr.vmem [resolvable:$true] %s71_s24 }
  0x15   :  { %27 = vadd.xlane.f32.xlu0 %v26_v2  ;;  %s111_s1 = scalar_lea.vmem %s72_s24, 256  ;;  %p116_p9 = scmp.lt.s32.totalorder %s72_s24, %s72_s24 }
  0x16   :  { %p112_p8 = scmp.ne.s32.totalorder %s72_s24, %s111_s1  ;;  %p117_p10 = scmp.lt.s32.totalorder %s111_s1, %s111_s1 }
  0x18   :  { %p118_p11 = por %p117_p10, %p116_p9 }
  0x1a   :  { %p119_p12 = pnand %p118_p11, %p112_p8 }
  0xa2   :  { %v28_v3 = vpop.xlane.xlu0 %27 }
  0xa3   :  { %v29_v4 = vmul.f32 0.00390625, %v28_v3 }
  0xa5   :  { %v30_v5 = vsub.f32 %v24_v0, %v29_v4  ;;  %v31_v6 = vsub.f32 %v25_v1, %v29_v4 }
  0xa7   :  { %v32_v7 = vmul.f32 %v30_v5, %v30_v5  ;;  %v33_v8 = vmul.f32 %v31_v6, %v31_v6 }
  0xa9   :  { %v34_v9 = vadd.f32 %v33_v8, %v32_v7 }
  0xab   :  { %35 = vadd.xlane.f32.xlu0 %v34_v9 }
 0x138   :  { %v36_v11 = vpop.xlane.xlu0 %35 }
 0x139   :  { %v37_v12 = vmax.f32 %v36_v11, 0.0 }
 0x13b   :  { %v38_v13 = vmul.f32 0.003921569, %v37_v12 }
 0x13d   :  { %v39_v14 = vadd.f32 1e-05, %v38_v13 }
 0x13f   :  { %87 = vrsqrt.f32 %v39_v14 }
 0x149   :  { %v88_v17 = vpop.eup %87 }
 0x14a   :  { %v42_v18 = vmul.f32 %v88_v17, %v41_v16 }
 0x14c   :  { %v43_v19 = vmul.f32 %v42_v18, %v29_v4 }
 0x14e   :  { %45 = vrot.lane.b32.xlu1 %v43_v19, %s140_s22 }
 0x152   :  { %51 = vperm.xlu1 %85, %v42_v18  }
 0x1c0   :  { %v46_v20 = vpop.permute.xlu1 %45 }
 0x1c1   :  { %v48_v21 = vsub.f32 %v41_v16, %v46_v20 }
 0x1c3   :  { %58 = vperm.xlu0 %86, %v48_v21  }
 0x1d1   :  { %v52_v22 = vpop.permute.xlu1 %51 }
 0x1d2   :  { %v54_v23 = vmul.f32 %v52_v22, %v24_v0  ;;  %v55_v24 = vmul.f32 %v52_v22, %v25_v1 }
 0x242   :  { %v59_v25 = vpop.permute.xlu0 %58 }
 0x243   :  { %v61_v26 = vadd.f32 %v59_v25, %v54_v23  ;;  %v62_v27 = vadd.f32 %v59_v25, %v55_v24 }
 0x245   :  { %63 = vst [vmem:[#allocation5] sm:$0xff] %v61_v26  ;;  %64 = vst [vmem:[#allocation5 + $0x8] sm:$0xff] %v62_v27 }
 0x246   :  { %122 = shalt.err (!%p119_p12)
}
 0x247   :  { %s123_s27 = scalar_lea.hbm %s186_s2, 256 }
 0x248   :  { %p124_p13 = scmp.ne.s32.totalorder %s186_s2, %s123_s27  ;;  %p127_p0 = scmp.lt.u32.totalorder %s123_s27, %s186_s2 }
 0x24a   :  { %p129_p1 = pnand %p127_p0, %p124_p13 }
 0x24c   :  { %132 = shalt.err (!%p129_p1)
}
 0x24d   :  { %74 = dma.vmem_to_hbm [thread:$0]  %s72_s24, 256, %s186_s2, [#allocation4]  }
 0x24e   :  { %135 = dma.done.wait [#allocation4], 256  }
 0x24f   :  { %136 = vsyncadd [#allocation4], 4294967040 }
 0x250   :  { %78 = vsyncpa [#allocation3], 1 }
 0x251   :  { %79 = vsyncpa [#allocation4], 1 }

</bundles_post_ra>
